<compile_context>
chip_gen: v7x
topology: tpu7x:2x2x1
jax: 0.10.0
libtpu: 0.0.40
codegen_flags: <defaults>
</compile_context>

<pallas_src>
import functools

import jax
import jax.numpy as jnp
from jax import lax
from jax.experimental import pallas as pl
from jax.experimental.pallas import tpu as pltpu


_TILE_BYTES = 4 * 1024 * 1024          # ~4 MiB per input tile
_VMEM_LIMIT = 48 * 1024 * 1024         # safe on v5e/v6e (128 MiB) and v7x (64 MiB)


def _weighted_l2_kernel(pred_ref, targ_ref, w_ref, out_ref, acc_ref, *,
                        batch, tb, inner, fold_weight, need_mask):
    """One grid step over a (tb, tc) tile.

    pred_ref, targ_ref : (tb, tc) VMEM tiles, native dtype (cast in-kernel)
    w_ref              : (1, tc)  f32 weight chunk (constant when fold_weight)
    out_ref            : (1, 8, 128) per-core partial-sum block (lane dense)
    acc_ref            : (8 | tb, tc) f32 scratch, resident across the grid
    """
    c = pl.program_id(0)        # core split           ("parallel")
    cb = pl.program_id(1)       # lane-column block    ("arbitrary")
    rb = pl.program_id(2)       # batch-row block      ("arbitrary")
    n_cb = pl.num_programs(1)
    n_rb = pl.num_programs(2)

    @pl.when(jnp.logical_and(cb == 0, rb == 0))
    def _init():
        acc_ref[...] = jnp.zeros_like(acc_ref)

    # Cast after load: HBM traffic stays at the native input width.
    d = pred_ref[...].astype(jnp.float32) - targ_ref[...].astype(jnp.float32)
    dd = d * d
    if not fold_weight:
        # Lane axis is tiled: apply this column chunk's weights now.
        dd = dd * w_ref[...]

    def accumulate(vals):
        if tb % 8 == 0:
            # Fold batch rows down to 8 sublanes with pure cross-vreg VALU adds
            # (no cross-lane/XLU work, no full-tile accumulator traffic).
            vals = vals.reshape(tb // 8, 8, vals.shape[-1]).sum(axis=0)
        acc_ref[...] += vals

    if need_mask:
        row0 = (c * inner + rb) * tb               # virtual global first row
        is_ragged = row0 + tb > batch

        @pl.when(is_ragged)
        def _tail():                               # only the tail tile pays for the select
            rows = row0 + lax.broadcasted_iota(jnp.int32, dd.shape, 0)
            accumulate(jnp.where(rows < batch, dd, 0.0))

        @pl.when(jnp.logical_not(is_ragged))
        def _body():
            accumulate(dd)
    else:
        accumulate(dd)

    @pl.when(jnp.logical_and(cb == n_cb - 1, rb == n_rb - 1))
    def _finalize():
        acc = acc_ref[...]
        if fold_weight:
            acc = acc * w_ref[...]                 # weights applied once, not per step
        total = jnp.sum(acc)                       # single cross-lane/sublane reduction
        out_ref[...] = jnp.full(out_ref.shape, total, dtype=jnp.float32)


def _pick_tiles(batch, ht, itemsize):
    """Pick (tb, tc): batch rows x lane columns per ~_TILE_BYTES input tile."""
    rows_full = _TILE_BYTES // max(1, ht * itemsize)
    if batch <= rows_full:
        return batch, ht                           # whole problem in one tile
    if rows_full >= 8:
        return (rows_full // 8) * 8, ht            # fat full-width batch tiles
    # H*T too wide even for 8 full-width rows: tile the lane axis too.
    if ht % 128 == 0:
        n128 = ht // 128
        budget = max(1, _TILE_BYTES // (8 * 128 * itemsize))
        best = max(d for d in range(1, n128 + 1) if n128 % d == 0 and d <= budget)
        tc = 128 * best
        tb = max(8, (_TILE_BYTES // (tc * itemsize) // 8) * 8)
        return min(tb, max(8, (batch // 8) * 8)), tc
    # TODO(synk): ragged lane-axis tiling when H*T is huge and not 128-aligned.
    return (batch if batch < 8 else 8), ht


def weighted_loss(pred, targ, weights):
    """Pallas implementation of WeightedLoss.forward (WeightedL2 _loss)."""
    B, H, T = pred.shape
    assert targ.shape == (B, H, T)
    assert weights.shape == (H, T)
    HT = H * T
    denom = float(B * HT)                          # .mean() over every element

    # Lane-dense 2-D views; no dtype cast / no padding of the big inputs.
    pred2 = pred.reshape(B, HT)
    targ2 = targ.reshape(B, HT)
    w2 = weights.astype(jnp.float32).reshape(1, HT)    # tiny buffer, cast once

    itemsize = jnp.dtype(pred.dtype).itemsize
    tb, tc = _pick_tiles(B, HT, itemsize)

    n_cb = HT // tc                                # tc == HT or tc | HT
    n_rb_total = -(-B // tb)                       # ceil-div row blocks
    n_cores = 2 if n_rb_total >= 2 else 1          # no even-split restriction
    inner = -(-n_rb_total // n_cores)              # row blocks per core
    need_mask = n_cores * inner * tb > B           # ragged tail / virtual overhang
    fold_weight = (n_cb == 1)
    acc_rows = 8 if tb % 8 == 0 else tb

    def data_map(c, cb, rb):
        b = c * inner + rb
        if need_mask:
            # Clamp virtual overhang blocks onto the last real block; their
            # contribution is masked to zero in-kernel, the clamp only keeps
            # the DMA inside the array.
            b = jnp.minimum(b, n_rb_total - 1)
        return (b, cb)

    kernel = functools.partial(
        _weighted_l2_kernel, batch=B, tb=tb, inner=inner,
        fold_weight=fold_weight, need_mask=need_mask)

    out = pl.pallas_call(
        kernel,
        out_shape=jax.ShapeDtypeStruct((n_cores, 8, 128), jnp.float32),
        grid_spec=pltpu.PrefetchScalarGridSpec(
            num_scalar_prefetch=0,
            grid=(n_cores, n_cb, inner),
            in_specs=[
                pl.BlockSpec((tb, tc), data_map),
                pl.BlockSpec((tb, tc), data_map),
                pl.BlockSpec((1, tc), lambda c, cb, rb: (0, cb)),
            ],
            out_specs=pl.BlockSpec((1, 8, 128), lambda c, cb, rb: (c, 0, 0)),
            scratch_shapes=[pltpu.VMEM((acc_rows, tc), jnp.float32)],
        ),
        compiler_params=pltpu.CompilerParams(
            dimension_semantics=("parallel", "arbitrary", "arbitrary"),
            vmem_limit_bytes=_VMEM_LIMIT,
        ),
    )(pred2, targ2, w2)

    partials = out[:, 0, 0]                        # one scalar per core
    return jnp.sum(partials) / denom


if __name__ == "__main__":
    # Small shapes consistent with [batch_size x horizon x transition_dim].
    B, H, T = 2, 8, 32

    key = jax.random.PRNGKey(0)
    k1, k2 = jax.random.split(key)
    pred = jax.random.normal(k1, (B, H, T), dtype=jnp.float32)
    targ = jax.random.normal(k2, (B, H, T), dtype=jnp.float32)

    # Deterministic "buffer" weights (diffuser-style horizon discounting).
    discount = 0.99
    discounts = discount ** jnp.arange(H, dtype=jnp.float32)      # [H]
    weights = jnp.broadcast_to(discounts[:, None], (H, T))        # [H, T]

    loss = weighted_loss(pred, targ, weights)
    loss = jax.block_until_ready(loss)

    # Pure-JAX reference of the PyTorch forward (WeightedL2 semantics).
    ref = jnp.mean(((pred - targ) ** 2) * weights[None, :, :])
    assert jnp.allclose(loss, ref, rtol=1e-5, atol=1e-6), (loss, ref)

    print("KERNEL_OK")
</pallas_src>

<mosaic_0001>
module attributes {stable_mosaic.version = 11 : i64} {
  func.func @_weighted_l2_kernel(%arg0: i32, %arg1: i32, %arg2: i32, %arg3: memref<2x256xf32, #tpu.memory_space<vmem>>, %arg4: memref<2x256xf32, #tpu.memory_space<vmem>>, %arg5: memref<1x256xf32, #tpu.memory_space<vmem>>, %arg6: memref<1x8x128xf32, #tpu.memory_space<vmem>>, %arg7: memref<2x256xf32, #tpu.memory_space<vmem>>) attributes {dimension_semantics = [#tpu.dimension_semantics<parallel>, #tpu.dimension_semantics<arbitrary>, #tpu.dimension_semantics<arbitrary>], iteration_bounds = array<i64: 1, 1, 1>, scalar_prefetch = 0 : i64, scratch_operands = 1 : i64, tpu.core_type = #tpu.core_type<tc>, window_params = [{transform_indices = @transform_0, window_bounds = array<i64: 2, 256>}, {transform_indices = @transform_1, window_bounds = array<i64: 2, 256>}, {transform_indices = @transform_2, window_bounds = array<i64: 1, 256>}, {transform_indices = @transform_3, window_bounds = array<i64: 1, 8, 128>}]} {
    %c0_i32 = arith.constant 0 : i32
    %0 = arith.cmpi eq, %arg1, %c0_i32 : i32
    %c0_i32_0 = arith.constant 0 : i32
    %1 = arith.cmpi eq, %arg2, %c0_i32_0 : i32
    %2 = arith.andi %0, %1 : i1
    %3 = arith.extui %2 : i1 to i32
    %c0_i32_1 = arith.constant 0 : i32
    %4 = arith.cmpi ne, %3, %c0_i32_1 : i32
    scf.if %4 {
      %cst = arith.constant 0.000000e+00 : f32
      %17 = vector.broadcast %cst : f32 to vector<2x256xf32>
      %c0_12 = arith.constant 0 : index
      %c0_13 = arith.constant 0 : index
      %18 = vector.load %arg7[%c0_12, %c0_13] : memref<2x256xf32, #tpu.memory_space<vmem>>, vector<2x256xf32>
      tpu.vector_store %arg7[%c0_12, %c0_13], %17 {strides = array<i32>} : memref<2x256xf32, #tpu.memory_space<vmem>>, vector<2x256xf32>,
    } else {
    }
    %c0 = arith.constant 0 : index
    %c0_2 = arith.constant 0 : index
    %5 = vector.load %arg3[%c0, %c0_2] : memref<2x256xf32, #tpu.memory_space<vmem>>, vector<2x256xf32>
    %c0_3 = arith.constant 0 : index
    %c0_4 = arith.constant 0 : index
    %6 = vector.load %arg4[%c0_3, %c0_4] : memref<2x256xf32, #tpu.memory_space<vmem>>, vector<2x256xf32>
    %7 = arith.subf %5, %6 : vector<2x256xf32>
    %8 = arith.mulf %7, %7 : vector<2x256xf32>
    %c0_5 = arith.constant 0 : index
    %c0_6 = arith.constant 0 : index
    %9 = vector.load %arg7[%c0_5, %c0_6] : memref<2x256xf32, #tpu.memory_space<vmem>>, vector<2x256xf32>
    %10 = arith.addf %9, %8 : vector<2x256xf32>
    %c0_7 = arith.constant 0 : index
    %c0_8 = arith.constant 0 : index
    %11 = vector.load %arg7[%c0_7, %c0_8] : memref<2x256xf32, #tpu.memory_space<vmem>>, vector<2x256xf32>
    tpu.vector_store %arg7[%c0_7, %c0_8], %10 {strides = array<i32>} : memref<2x256xf32, #tpu.memory_space<vmem>>, vector<2x256xf32>,
    %c0_i32_9 = arith.constant 0 : i32
    %12 = arith.cmpi eq, %arg1, %c0_i32_9 : i32
    %c0_i32_10 = arith.constant 0 : i32
    %13 = arith.cmpi eq, %arg2, %c0_i32_10 : i32
    %14 = arith.andi %12, %13 : i1
    %15 = arith.extui %14 : i1 to i32
    %c0_i32_11 = arith.constant 0 : i32
    %16 = arith.cmpi ne, %15, %c0_i32_11 : i32
    scf.if %16 {
      %c0_12 = arith.constant 0 : index
      %c0_13 = arith.constant 0 : index
      %17 = vector.load %arg7[%c0_12, %c0_13] : memref<2x256xf32, #tpu.memory_space<vmem>>, vector<2x256xf32>
      %c0_14 = arith.constant 0 : index
      %c0_15 = arith.constant 0 : index
      %18 = vector.load %arg5[%c0_14, %c0_15] : memref<1x256xf32, #tpu.memory_space<vmem>>, vector<1x256xf32>
      %19 = vector.broadcast %18 : vector<1x256xf32> to vector<2x256xf32>
      %20 = arith.mulf %17, %19 : vector<2x256xf32>
      %21 = vector.shape_cast %20 : vector<2x256xf32> to vector<1x2x256xf32>
      %cst = arith.constant dense<0.000000e+00> : vector<1xf32>
      %22 = vector.multi_reduction <add>, %21, %cst [1, 2] : vector<1x2x256xf32> to vector<1xf32>
      %23 = vector.shape_cast %22 : vector<1xf32> to vector<1x1x1xf32>
      %24 = vector.extract %23[0, 0, 0] : f32 from vector<1x1x1xf32>
      %25 = vector.broadcast %24 : f32 to vector<1x8x128xf32>
      %c0_16 = arith.constant 0 : index
      %c0_17 = arith.constant 0 : index
      %c0_18 = arith.constant 0 : index
      %26 = vector.load %arg6[%c0_16, %c0_17, %c0_18] : memref<1x8x128xf32, #tpu.memory_space<vmem>>, vector<1x8x128xf32>
      tpu.vector_store %arg6[%c0_16, %c0_17, %c0_18], %25 {strides = array<i32>} : memref<1x8x128xf32, #tpu.memory_space<vmem>>, vector<1x8x128xf32>,
    } else {
    }
    return
  }
  func.func @transform_0(%arg0: i32, %arg1: i32, %arg2: i32) -> (i32, i32) {
    %c1_i32 = arith.constant 1 : i32
    %0 = arith.muli %arg0, %c1_i32 : i32
    %1 = arith.addi %0, %arg2 : i32
    %c0_i32 = arith.constant 0 : i32
    return %1, %arg1 : i32, i32
  }
  func.func @transform_1(%arg0: i32, %arg1: i32, %arg2: i32) -> (i32, i32) {
    %c1_i32 = arith.constant 1 : i32
    %0 = arith.muli %arg0, %c1_i32 : i32
    %1 = arith.addi %0, %arg2 : i32
    %c0_i32 = arith.constant 0 : i32
    return %1, %arg1 : i32, i32
  }
  func.func @transform_2(%arg0: i32, %arg1: i32, %arg2: i32) -> (i32, i32) {
    %c0_i32 = arith.constant 0 : i32
    %c0_i32_0 = arith.constant 0 : i32
    return %c0_i32, %arg1 : i32, i32
  }
  func.func @transform_3(%arg0: i32, %arg1: i32, %arg2: i32) -> (i32, i32, i32) {
    %c0_i32 = arith.constant 0 : i32
    %c0_i32_0 = arith.constant 0 : i32
    %c0_i32_1 = arith.constant 0 : i32
    return %arg0, %c0_i32, %c0_i32_0 : i32, i32, i32
  }
}

</mosaic_0001>

<bundles_post_ra>
// kernel: tpu_custom_call.1
= control target key start
LH: loop header
LB: loop body
LE: loop exit
PB: predicated region body
PF: predicated region fallthrough
CT: control target
= control target key end

     0   :  { %8 = vsyncpa [#allocation4], 0  ;;  %s271_s0 = inlined_call_operand.hbm [shape: f32[2,256], index: 0, kind: input, shape index: {}]   ;;  %s272_s1 = inlined_call_operand.hbm [shape: f32[2,256], index: 1, kind: input, shape index: {}]   ;;  %s273_s2 = inlined_call_operand.vmem [shape: f32[1,256], index: 2, kind: input, shape index: {}]   ;;  %s274_s3 = inlined_call_operand.hbm [shape: f32[1,8,128], index: 3, kind: output, shape index: {}]  }
   0x1   :  { %9 = vsyncpa [#allocation7], 0 }
   0x2   :  { %10 = vsyncpa [#allocation5], 0  ;;  %s207_s12 = smov [#allocation3]   ;;  %s208_s14 = smov [#allocation6]  }
   0x3   :  { %s21_s13 = sshll.u32 %s207_s12, 4  ;;  %s35_s15 = sshll.u32 %s208_s14, 4  ;;  %s22_s13 = int_to_ptr.vmem [resolvable:$true] %s21_s13  ;;  %s36_s15 = int_to_ptr.vmem [resolvable:$true] %s35_s15 }
   0x4   :  { %s135_s18 = scalar_lea.hbm %s271_s0, 64 }
   0x5   :  { %p136_p0 = scmp.ne.s32.totalorder %s271_s0, %s135_s18  ;;  %p139_p1 = scmp.lt.u32.totalorder %s135_s18, %s271_s0 }
   0x7   :  { %p141_p2 = pnand %p139_p1, %p136_p0 }
   0x9   :  { %144 = shalt.err (!%p141_p2)
}
   0xa   :  { %s145_s23 = scalar_lea.vmem %s22_s13, 64  ;;  %p150_p4 = scmp.lt.s32.totalorder %s22_s13, %s22_s13 }
   0xb   :  { %p146_p3 = scmp.ne.s32.totalorder %s22_s13, %s145_s23  ;;  %p151_p5 = scmp.lt.s32.totalorder %s145_s23, %s145_s23 }
   0xd   :  { %p152_p6 = por %p151_p5, %p150_p4 }
   0xf   :  { %p153_p7 = pnand %p152_p6, %p146_p3 }
  0x11   :  { %156 = shalt.err (!%p153_p7)
}
  0x12   :  { %24 = dma.hbm_to_vmem [thread:$0]  %s271_s0, 64, %s22_s13, [#allocation4]  }
  0x13   :  { %s157_s28 = scalar_lea.hbm %s272_s1, 64 }
  0x14   :  { %p158_p8 = scmp.ne.s32.totalorder %s272_s1, %s157_s28  ;;  %p161_p9 = scmp.lt.u32.totalorder %s157_s28, %s272_s1 }
  0x16   :  { %p163_p10 = pnand %p161_p9, %p158_p8 }
  0x18   :  { %166 = shalt.err (!%p163_p10)
}
  0x19   :  { %s167_s6 = scalar_lea.vmem %s36_s15, 64  ;;  %p172_p12 = scmp.lt.s32.totalorder %s36_s15, %s36_s15 }
  0x1a   :  { %p168_p11 = scmp.ne.s32.totalorder %s36_s15, %s167_s6  ;;  %p173_p13 = scmp.lt.s32.totalorder %s167_s6, %s167_s6 }
  0x1c   :  { %p174_p0 = por %p173_p13, %p172_p12 }
  0x1e   :  { %p175_p1 = pnand %p174_p0, %p168_p11 }
  0x20   :  { %178 = shalt.err (!%p175_p1)
}
  0x21   :  { %38 = dma.hbm_to_vmem [thread:$0]  %s272_s1, 64, %s36_s15, [#allocation7]  }
  0x22   :  { %201 = dma.done.wait [#allocation4], 64  }
  0x23   :  { %202 = vsyncadd [#allocation4], 4294967232 }
  0x24   :  { %203 = dma.done.wait [#allocation7], 64  }
  0x25   :  { %204 = vsyncadd [#allocation7], 4294967232  ;;  %v68_v0 = vlaneseq  ;;  %v209_v1 = vmov 0.0   ;;  %v210_v5 = vmov 1983009808   ;;  %vm97_vm0 = vcmask 1041408  }
  0x26   :  { %55 = vst [vmem:[#allocation2] sm:$0xf] %v209_v1  ;;  %v78_v6 = vunpack.c.l.s4 %v210_v5  ;;  %v56_v7 = vld [vmem:[#allocation3] sm:$0xf]  ;;  %v57_v8 = vld [vmem:[#allocation6] sm:$0xf] }
  0x27   :  { %v69_v2 = vshrl.u32 %v68_v0, 7  ;;  %v66_v9 = vld [vmem:[%s273_s2] sm:$0x3]  ;;  %v58_v10 = vsub.f32 %v56_v7, %v57_v8  ;;  %s211_s1 = smov [#allocation8]  }
  0x28   :  { %v79_v15 = vunpack.c.0.s8 %v78_v6  ;;  %s118_s2 = sshll.u32 %s211_s1, 4  ;;  %s119_s2 = int_to_ptr.vmem [resolvable:$true] %s118_s2 }
  0x29   :  { %v70_v3 = vsub.s32 0, %v69_v2  ;;  %v74_v4 = vsub.s32 1, %v69_v2  ;;  %v59_v12 = vmul.f32 %v58_v10, %v58_v10  ;;  %s179_s11 = scalar_lea.vmem %s119_s2, 128  ;;  %p184_p3 = scmp.lt.s32.totalorder %s119_s2, %s119_s2 }
  0x2a   :  { %v82_v18 = vsub.s32 %v79_v15, %v69_v2  ;;  %p180_p2 = scmp.ne.s32.totalorder %s119_s2, %s179_s11  ;;  %p185_p4 = scmp.lt.s32.totalorder %s179_s11, %s179_s11 }
  0x2b   :  { %v71_v13 = vrot.slane %v66_v9, %v70_v3  ;;  %v75_v14 = vrot.slane %v66_v9, %v74_v4 }
  0x2c   :  { %p186_p5 = por %p185_p4, %p184_p3 }
  0x2d   :  { %v60_v11 = vld [vmem:[#allocation2] sm:$0xf]  ;;  %v76_v17 = vcombine.low %v71_v13, %v75_v14 }
  0x2e   :  { %v61_v16 = vadd.f32 %v60_v11, %v59_v12  ;;  %p187_p6 = pnand %p186_p5, %p180_p2 }
  0x2f   :  { %v83_v19 = vrot.slane %v76_v17, %v82_v18 }
  0x30   :  { %62 = vst [vmem:[#allocation2] sm:$0xf] %v61_v16 }
  0x37   :  { %v65_v20 = vld [vmem:[#allocation2] sm:$0xf] }
  0x38   :  { %v85_v21 = vmul.f32 %v83_v19, %v65_v20 }
  0x3a   :  { %v93_v22 = vrot.slane %v85_v21, %v82_v18 }
  0x3c   :  { %v94_v23 = vcombine.high %v93_v22, %v93_v22  ;;  %v98_v24 = vsel %vm97_vm0, %v93_v22, 0.0 }
  0x3e   :  { %v99_v25 = vsel %vm97_vm0, %v94_v23, 0.0 }
  0x3f   :  { %v100_v26 = vadd.f32 %v99_v25, %v98_v24 }
  0x41   :  { %101 = vadd.xlane.f32.xlu0 %v100_v26 }
  0xce   :  { %v102_v27 = vpop.xlane.xlu0 %101 }
  0xcf   :  { %v103_v28 = vrot.slane %v102_v27, 4 }
  0xd1   :  { %v104_v29 = vadd.f32 %v103_v28, %v102_v27 }
  0xd3   :  { %v105_v30 = vrot.slane %v104_v29, 2 }
  0xd5   :  { %v106_v31 = vadd.f32 %v105_v30, %v104_v29 }
  0xd7   :  { %v107_v32 = vrot.slane %v106_v31, 1 }
  0xd9   :  { %v108_v33 = vadd.f32 %v107_v32, %v106_v31 }
  0xdb   :  { %128 = vpush %v108_v33 }
 0x10c   :  { %s129_s10 = spop %128 }
 0x10d   :  { %v110_v34 = vstv %s129_s10 }
 0x10e   :  { %111 = vst [vmem:[#allocation8] sm:$0xff] %v110_v34 }
 0x10f   :  { %190 = shalt.err (!%p187_p6)
}
 0x110   :  { %s191_s14 = scalar_lea.hbm %s274_s3, 128 }
 0x111   :  { %p192_p7 = scmp.ne.s32.totalorder %s274_s3, %s191_s14  ;;  %p195_p8 = scmp.lt.u32.totalorder %s191_s14, %s274_s3 }
 0x113   :  { %p197_p9 = pnand %p195_p8, %p192_p7 }
 0x115   :  { %200 = shalt.err (!%p197_p9)
}
 0x116   :  { %121 = dma.vmem_to_hbm [thread:$0]  %s119_s2, 128, %s274_s3, [#allocation5]  }
 0x117   :  { %205 = dma.done.wait [#allocation5], 128  }
 0x118   :  { %206 = vsyncadd [#allocation5], 4294967168 }
 0x119   :  { %125 = vsyncpa [#allocation4], 1 }
 0x11a   :  { %126 = vsyncpa [#allocation7], 1 }
 0x11b   :  { %127 = vsyncpa [#allocation5], 1 }

</bundles_post_ra>
